<compile_context>
chip_gen: v7x
topology: tpu7x:2x2x1
jax: 0.10.0
libtpu: 0.0.40
codegen_flags: <defaults>
</compile_context>

<pallas_src>
import functools

import jax
import jax.numpy as jnp
import numpy as np
from jax.experimental import pallas as pl
from jax.experimental.pallas import tpu as pltpu


def _round_up(x, m):
    return ((x + m - 1) // m) * m


def _vmem_estimate_bytes(tile, feat_dim, itemsize):
    return int(4 * tile * feat_dim * itemsize      # fi + fj, double-buffered
               + 10 * tile * tile * 4              # tri plane + gram/dist2/hinged temps
               + 16 * tile * 4                     # small slabs, acc, output block
               )


def _hinge_loss_kernel(bi_ref, bj_ref, cnt_ref,            # scalar-prefetch (SMEM)
                       fi_ref, fj_ref,                     # [T, D] feature blocks
                       sqr_ref, sqc_ref,                   # [T, 1], [1, T] sq-norms
                       labr_ref, labc_ref,                 # [T, 1], [1, T] int labels
                       out_ref,                            # (1, 8, T) per-shard partial
                       acc_ref, tri_ref, cval_ref,         # scratch
                       *, margin, n_valid, tile, nb, pmax, pad):
    s = pl.program_id(0)                                   # shard (parallel on v7x)
    t = pl.program_id(1)                                   # pair index within shard
    land = jnp.logical_and

    @pl.when(t == 0)
    def _init():
        acc_ref[...] = jnp.zeros_like(acc_ref)
        # Hoisted masks, built once per shard/core instead of per masked tile.
        r = jax.lax.broadcasted_iota(jnp.int32, (tile, tile), 0)
        c = jax.lax.broadcasted_iota(jnp.int32, (tile, tile), 1)
        tri_ref[...] = (c > r).astype(jnp.float32)         # strict-upper triangle
        cc = jax.lax.broadcasted_iota(jnp.int32, (1, tile), 1)
        cval_ref[...] = (cc < (n_valid - (nb - 1) * tile)).astype(jnp.float32)

    idx = s * pmax + t
    bi = bi_ref[idx]
    bj = bj_ref[idx]
    real = t < cnt_ref[s]                                  # skip padded pair slots

    # Gram block on the MXU, contracting over D (no explicit transpose).
    gram = jax.lax.dot_general(
        fi_ref[...], fj_ref[...],
        dimension_numbers=(((1,), (1,)), ((), ())),
        preferred_element_type=jnp.float32)                # [T, T]

    # ||f_i - f_j||^2 = ||f_i||^2 + ||f_j||^2 - 2 f_i . f_j
    dist2 = (sqr_ref[...] + sqc_ref[...]) - 2.0 * gram     # [T, T]

    # L_S: +1 same class / -1 different class, folded with 0.05 and the margin.
    same = labr_ref[...] == labc_ref[...]                  # [T, T]
    a_c = jnp.float32(0.05 - margin)                       # same-class constant
    b_c = jnp.float32(0.05 + margin)                       # diff-class constant
    hinged = jnp.maximum(jnp.where(same, a_c + dist2, b_c - dist2), 0.0)

    is_diag = bi == bj

    if pad == 0:
        # No ragged column block: only interior (bj > bi) and diagonal tiles exist.
        @pl.when(land(real, bj > bi))
        def _acc_interior():
            acc_ref[...] += jnp.sum(hinged, axis=0, keepdims=True)

        @pl.when(land(real, is_diag))
        def _acc_diag():
            acc_ref[...] += jnp.sum(hinged * tri_ref[...], axis=0, keepdims=True)
    else:
        is_rag = bj == (nb - 1)                            # ragged column block

        @pl.when(land(real, land(bj > bi, jnp.logical_not(is_rag))))
        def _acc_interior():
            acc_ref[...] += jnp.sum(hinged, axis=0, keepdims=True)

        @pl.when(land(real, land(is_diag, jnp.logical_not(is_rag))))
        def _acc_diag():
            acc_ref[...] += jnp.sum(hinged * tri_ref[...], axis=0, keepdims=True)

        @pl.when(land(real, land(jnp.logical_not(is_diag), is_rag)))
        def _acc_ragged():
            # Column validity is constant along rows: apply it after the reduce.
            acc_ref[...] += cval_ref[...] * jnp.sum(hinged, axis=0, keepdims=True)

        @pl.when(land(real, land(is_diag, is_rag)))
        def _acc_ragged_diag():
            acc_ref[...] += cval_ref[...] * jnp.sum(
                hinged * tri_ref[...], axis=0, keepdims=True)

    @pl.when(t == pl.num_programs(1) - 1)
    def _finalize():
        out_ref[...] = jnp.zeros_like(out_ref)
        out_ref[0, 0:1, :] = acc_ref[...]


def hinge_loss(one_hot_codes, features, margin=0.44, tile=512):
    """Pallas TPU implementation of HingeLoss.forward (mean over all N*N entries)."""
    n, feat_dim = features.shape
    itemsize = np.dtype(features.dtype).itemsize

    # Tile selection: keep the lane dim a multiple of 128, shrink for tiny batches,
    # and halve while the footprint would blow past v7x's smaller VMEM budget.
    tile = max(128, _round_up(int(tile), 128))
    tile = int(min(tile, max(128, _round_up(n, 128))))
    while tile > 128 and _vmem_estimate_bytes(tile, feat_dim, itemsize) > 24 * 2**20:
        tile //= 2

    n_pad = _round_up(n, tile)
    nb = n_pad // tile
    pad = n_pad - n

    # Labels (argmax of the one-hot codes) and per-row squared norms, computed once.
    labels = jnp.argmax(one_hot_codes, axis=1).astype(jnp.int32)
    feat_f32 = features.astype(jnp.float32)
    sq = jnp.sum(feat_f32 * feat_f32, axis=1)

    feat_p = jnp.pad(features, ((0, pad), (0, 0)))
    sq_p = jnp.pad(sq, (0, pad))
    lab_p = jnp.pad(labels, (0, pad), constant_values=-1)

    sq_row = sq_p.reshape(n_pad, 1)
    sq_col = sq_p.reshape(1, n_pad)
    lab_row = lab_p.reshape(n_pad, 1)
    lab_col = lab_p.reshape(1, n_pad)

    # Strict-upper-triangular block pairs, row-block-major so the row tile stays
    # VMEM-resident across its inner column sweep; split into (up to) 2 shards of
    # near-equal pair count for the two v7x TensorCores.
    pairs = [(i, j) for i in range(nb) for j in range(i, nb)]
    num_pairs = len(pairs)
    num_shards = 2 if num_pairs >= 2 else 1
    pmax = -(-num_pairs // num_shards)

    bi_l, bj_l, cnt_l = [], [], []
    for sh in range(num_shards):
        chunk = pairs[sh * pmax:(sh + 1) * pmax]
        cnt_l.append(len(chunk))
        chunk = chunk + [(0, 0)] * (pmax - len(chunk))     # padded slots, gated off
        bi_l.extend(p[0] for p in chunk)
        bj_l.extend(p[1] for p in chunk)
    bi_arr = jnp.asarray(bi_l, dtype=jnp.int32)
    bj_arr = jnp.asarray(bj_l, dtype=jnp.int32)
    cnt_arr = jnp.asarray(cnt_l, dtype=jnp.int32)

    kernel = functools.partial(_hinge_loss_kernel, margin=float(margin),
                               n_valid=n, tile=tile, nb=nb, pmax=pmax, pad=pad)

    grid_spec = pltpu.PrefetchScalarGridSpec(
        num_scalar_prefetch=3,
        grid=(num_shards, pmax),
        in_specs=[
            pl.BlockSpec((tile, feat_dim),
                         lambda s, t, bi, bj, cnt: (bi[s * pmax + t], 0)),  # row feats
            pl.BlockSpec((tile, feat_dim),
                         lambda s, t, bi, bj, cnt: (bj[s * pmax + t], 0)),  # col feats
            pl.BlockSpec((tile, 1),
                         lambda s, t, bi, bj, cnt: (bi[s * pmax + t], 0)),  # row sq
            pl.BlockSpec((1, tile),
                         lambda s, t, bi, bj, cnt: (0, bj[s * pmax + t])),  # col sq
            pl.BlockSpec((tile, 1),
                         lambda s, t, bi, bj, cnt: (bi[s * pmax + t], 0)),  # row labels
            pl.BlockSpec((1, tile),
                         lambda s, t, bi, bj, cnt: (0, bj[s * pmax + t])),  # col labels
        ],
        out_specs=pl.BlockSpec((1, 8, tile), lambda s, t, bi, bj, cnt: (s, 0, 0)),
        scratch_shapes=[pltpu.VMEM((1, tile), jnp.float32),      # lane-dense partial sum
                        pltpu.VMEM((tile, tile), jnp.float32),   # triangle plane
                        pltpu.VMEM((1, tile), jnp.float32)],     # column-validity row
    )

    vmem_need = _vmem_estimate_bytes(tile, feat_dim, itemsize)
    vmem_limit = int(min(100 * 2**20, max(32 * 2**20, 2 * vmem_need)))

    # Row tiles are VMEM-resident across each inner column sweep: fetched ~nb times,
    # column tiles ~num_pairs times.
    cost = pl.CostEstimate(
        flops=2 * num_pairs * tile * tile * feat_dim,
        transcendentals=0,
        bytes_accessed=int((num_pairs + nb) * tile * feat_dim * itemsize
                           + (num_pairs + nb) * tile * 16
                           + num_shards * 8 * tile * 4),
    )

    out = pl.pallas_call(
        kernel,
        out_shape=jax.ShapeDtypeStruct((num_shards, 8, tile), jnp.float32),
        grid_spec=grid_spec,
        compiler_params=pltpu.CompilerParams(
            dimension_semantics=("parallel", "arbitrary"),
            vmem_limit_bytes=vmem_limit),
        cost_estimate=cost,
    )(bi_arr, bj_arr, cnt_arr, feat_p, feat_p, sq_row, sq_col, lab_row, lab_col)

    # Per-shard partial sums live in row 0 of each shard's lane-dense slab.
    return jnp.sum(out[:, 0, :]) / jnp.float32(n * n)


def _hinge_loss_ref(one_hot_codes, features, margin=0.44):
    """Pure-JAX reference mirroring the PyTorch forward."""
    l_s = one_hot_codes @ one_hot_codes.T
    diff = features[:, None, :] - features[None, :, :]
    dist2 = jnp.sum(diff * diff, axis=2)
    d = margin - dist2
    l_s = jnp.where(l_s == 0.0, -1.0, l_s)
    d = 0.05 - l_s * d
    n = features.shape[0]
    mask = jnp.triu(jnp.ones((n, n), dtype=bool), k=1)
    loss = jnp.where(mask, jnp.maximum(d, 0.0), 0.0)
    return jnp.mean(loss)


if __name__ == "__main__":
    key = jax.random.PRNGKey(0)
    k1, k2, k3, k4, k5, k6 = jax.random.split(key, 6)

    # Small case (module-consistent shapes): N=8 samples, C=4 classes, D=32 features.
    N, C, D = 8, 4, 32
    labels = jax.random.randint(k1, (N,), 0, C)
    one_hot_codes = jax.nn.one_hot(labels, C, dtype=jnp.float32)       # [8, 4]
    features = jax.random.normal(k2, (N, D), dtype=jnp.float32)        # [8, 32]
    out = jax.block_until_ready(hinge_loss(one_hot_codes, features, margin=0.44))
    ref = _hinge_loss_ref(one_hot_codes, features, margin=0.44)
    assert np.allclose(np.asarray(out), np.asarray(ref), rtol=1e-4, atol=1e-5), (out, ref)

    # Ragged multi-block case at the default tile: diagonal / ragged / ragged-diag paths.
    N2, C2, D2 = 600, 10, 160
    labels2 = jax.random.randint(k3, (N2,), 0, C2)
    one_hot_codes2 = jax.nn.one_hot(labels2, C2, dtype=jnp.float32)
    features2 = jax.random.normal(k4, (N2, D2), dtype=jnp.float32)
    ref2 = _hinge_loss_ref(one_hot_codes2, features2, margin=0.44)
    out2 = jax.block_until_ready(hinge_loss(one_hot_codes2, features2, margin=0.44))
    assert np.allclose(np.asarray(out2), np.asarray(ref2), rtol=1e-4, atol=1e-5), (out2, ref2)

    # Same input at tile=128: also exercises interior (unmasked) blocks and 2-shard split.
    out3 = jax.block_until_ready(hinge_loss(one_hot_codes2, features2, margin=0.44, tile=128))
    assert np.allclose(np.asarray(out3), np.asarray(ref2), rtol=1e-4, atol=1e-5), (out3, ref2)

    # Exact-multiple case (pad == 0 static path).
    N4, C4, D4 = 256, 6, 64
    labels4 = jax.random.randint(k5, (N4,), 0, C4)
    one_hot_codes4 = jax.nn.one_hot(labels4, C4, dtype=jnp.float32)
    features4 = jax.random.normal(k6, (N4, D4), dtype=jnp.float32)
    out4 = jax.block_until_ready(hinge_loss(one_hot_codes4, features4, margin=0.44, tile=128))
    ref4 = _hinge_loss_ref(one_hot_codes4, features4, margin=0.44)
    assert np.allclose(np.asarray(out4), np.asarray(ref4), rtol=1e-4, atol=1e-5), (out4, ref4)

    print("KERNEL_OK")
</pallas_src>

<mosaic_0001>
module attributes {stable_mosaic.version = 11 : i64} {
  func.func @_hinge_loss_kernel(%arg0: i32, %arg1: i32, %arg2: memref<1xi32, #tpu.memory_space<smem>>, %arg3: memref<1xi32, #tpu.memory_space<smem>>, %arg4: memref<1xi32, #tpu.memory_space<smem>>, %arg5: memref<128x32xf32, #tpu.memory_space<vmem>>, %arg6: memref<128x32xf32, #tpu.memory_space<vmem>>, %arg7: memref<128x1xf32, #tpu.memory_space<vmem>>, %arg8: memref<1x128xf32, #tpu.memory_space<vmem>>, %arg9: memref<128x1xi32, #tpu.memory_space<vmem>>, %arg10: memref<1x128xi32, #tpu.memory_space<vmem>>, %arg11: memref<1x8x128xf32, #tpu.memory_space<vmem>>, %arg12: memref<1x128xf32, #tpu.memory_space<vmem>>, %arg13: memref<128x128xf32, #tpu.memory_space<vmem>>, %arg14: memref<1x128xf32, #tpu.memory_space<vmem>>) attributes {dimension_semantics = [#tpu.dimension_semantics<parallel>, #tpu.dimension_semantics<arbitrary>], iteration_bounds = array<i64: 1, 1>, scalar_prefetch = 3 : i64, scratch_operands = 3 : i64, tpu.core_type = #tpu.core_type<tc>, window_params = [{transform_indices = @transform_0, window_bounds = array<i64: 128, 32>}, {transform_indices = @transform_1, window_bounds = array<i64: 128, 32>}, {transform_indices = @transform_2, window_bounds = array<i64: 128, 1>}, {transform_indices = @transform_3, window_bounds = array<i64: 1, 128>}, {transform_indices = @transform_4, window_bounds = array<i64: 128, 1>}, {transform_indices = @transform_5, window_bounds = array<i64: 1, 128>}, {transform_indices = @transform_6, window_bounds = array<i64: 1, 8, 128>}]} {
    %c0_i32 = arith.constant 0 : i32
    %0 = arith.cmpi eq, %arg1, %c0_i32 : i32
    %1 = arith.extui %0 : i1 to i32
    %c0_i32_0 = arith.constant 0 : i32
    %2 = arith.cmpi ne, %1, %c0_i32_0 : i32
    scf.if %2 {
      %cst_25 = arith.constant 0.000000e+00 : f32
      %60 = vector.broadcast %cst_25 : f32 to vector<1x128xf32>
      %c0_26 = arith.constant 0 : index
      %c0_27 = arith.constant 0 : index
      %61 = vector.load %arg12[%c0_26, %c0_27] : memref<1x128xf32, #tpu.memory_space<vmem>>, vector<1x128xf32>
      tpu.vector_store %arg12[%c0_26, %c0_27], %60 {strides = array<i32>} : memref<1x128xf32, #tpu.memory_space<vmem>>, vector<1x128xf32>,
      %62 = tpu.iota {dimensions = array<i32: 0>} : vector<128x128xi32>
      %63 = tpu.iota {dimensions = array<i32: 1>} : vector<128x128xi32>
      %64 = arith.cmpi sgt, %63, %62 : vector<128x128xi32>
      %65 = arith.extui %64 : vector<128x128xi1> to vector<128x128xi32>
      %66 = arith.sitofp %65 : vector<128x128xi32> to vector<128x128xf32>
      %c0_28 = arith.constant 0 : index
      %c0_29 = arith.constant 0 : index
      %67 = vector.load %arg13[%c0_28, %c0_29] : memref<128x128xf32, #tpu.memory_space<vmem>>, vector<128x128xf32>
      tpu.vector_store %arg13[%c0_28, %c0_29], %66 {strides = array<i32>} : memref<128x128xf32, #tpu.memory_space<vmem>>, vector<128x128xf32>,
      %68 = tpu.iota {dimensions = array<i32: 1>} : vector<1x128xi32>
      %c8_i32 = arith.constant 8 : i32
      %69 = vector.broadcast %c8_i32 : i32 to vector<1x128xi32>
      %70 = arith.cmpi slt, %68, %69 : vector<1x128xi32>
      %71 = arith.extui %70 : vector<1x128xi1> to vector<1x128xi32>
      %72 = arith.sitofp %71 : vector<1x128xi32> to vector<1x128xf32>
      %c0_30 = arith.constant 0 : index
      %c0_31 = arith.constant 0 : index
      %73 = vector.load %arg14[%c0_30, %c0_31] : memref<1x128xf32, #tpu.memory_space<vmem>>, vector<1x128xf32>
      tpu.vector_store %arg14[%c0_30, %c0_31], %72 {strides = array<i32>} : memref<1x128xf32, #tpu.memory_space<vmem>>, vector<1x128xf32>,
    } else {
    }
    %c1_i32 = arith.constant 1 : i32
    %3 = arith.muli %arg0, %c1_i32 : i32
    %4 = arith.addi %3, %arg1 : i32
    %5 = arith.index_cast %4 : i32 to index
    %6 = memref.load %arg2[%5] : memref<1xi32, #tpu.memory_space<smem>>
    %7 = arith.index_cast %4 : i32 to index
    %8 = memref.load %arg3[%7] : memref<1xi32, #tpu.memory_space<smem>>
    %9 = arith.index_cast %arg0 : i32 to index
    %10 = memref.load %arg4[%9] : memref<1xi32, #tpu.memory_space<smem>>
    %11 = arith.cmpi slt, %arg1, %10 : i32
    %c0 = arith.constant 0 : index
    %c0_1 = arith.constant 0 : index
    %12 = vector.load %arg5[%c0, %c0_1] : memref<128x32xf32, #tpu.memory_space<vmem>>, vector<128x32xf32>
    %c0_2 = arith.constant 0 : index
    %c0_3 = arith.constant 0 : index
    %13 = vector.load %arg6[%c0_2, %c0_3] : memref<128x32xf32, #tpu.memory_space<vmem>>, vector<128x32xf32>
    %cst = arith.constant dense<0.000000e+00> : vector<128x128xf32>
    %14 = tpu.matmul %12, %13, %cst {dimension_numbers = #tpu.dot_dimension_numbers<[1], [1], [0], [0], [0, 0, 1, 0], [], []>} : vector<128x32xf32>, vector<128x32xf32>, vector<128x128xf32> -> vector<128x128xf32>
    %c0_4 = arith.constant 0 : index
    %c0_5 = arith.constant 0 : index
    %15 = vector.load %arg7[%c0_4, %c0_5] : memref<128x1xf32, #tpu.memory_space<vmem>>, vector<128x1xf32>
    %c0_6 = arith.constant 0 : index
    %c0_7 = arith.constant 0 : index
    %16 = vector.load %arg8[%c0_6, %c0_7] : memref<1x128xf32, #tpu.memory_space<vmem>>, vector<1x128xf32>
    %17 = vector.broadcast %15 : vector<128x1xf32> to vector<128x128xf32>
    %18 = vector.broadcast %16 : vector<1x128xf32> to vector<128x128xf32>
    %19 = arith.addf %17, %18 : vector<128x128xf32>
    %cst_8 = arith.constant 2.000000e+00 : f32
    %20 = vector.broadcast %cst_8 : f32 to vector<128x128xf32>
    %21 = arith.mulf %20, %14 : vector<128x128xf32>
    %22 = arith.subf %19, %21 : vector<128x128xf32>
    %c0_9 = arith.constant 0 : index
    %c0_10 = arith.constant 0 : index
    %23 = vector.load %arg9[%c0_9, %c0_10] : memref<128x1xi32, #tpu.memory_space<vmem>>, vector<128x1xi32>
    %c0_11 = arith.constant 0 : index
    %c0_12 = arith.constant 0 : index
    %24 = vector.load %arg10[%c0_11, %c0_12] : memref<1x128xi32, #tpu.memory_space<vmem>>, vector<1x128xi32>
    %25 = vector.broadcast %23 : vector<128x1xi32> to vector<128x128xi32>
    %26 = vector.broadcast %24 : vector<1x128xi32> to vector<128x128xi32>
    %27 = arith.cmpi eq, %25, %26 : vector<128x128xi32>
    %cst_13 = arith.constant -3.900000e-01 : f32
    %28 = vector.broadcast %cst_13 : f32 to vector<128x128xf32>
    %29 = arith.addf %28, %22 : vector<128x128xf32>
    %cst_14 = arith.constant 4.900000e-01 : f32
    %30 = vector.broadcast %cst_14 : f32 to vector<128x128xf32>
    %31 = arith.subf %30, %22 : vector<128x128xf32>
    %32 = arith.select %27, %29, %31 : vector<128x128xi1>, vector<128x128xf32>
    %cst_15 = arith.constant 0.000000e+00 : f32
    %33 = vector.broadcast %cst_15 : f32 to vector<128x128xf32>
    %34 = arith.maximumf %32, %33 : vector<128x128xf32>
    %35 = arith.cmpi eq, %6, %8 : i32
    %c0_i32_16 = arith.constant 0 : i32
    %36 = arith.cmpi eq, %8, %c0_i32_16 : i32
    %37 = arith.cmpi sgt, %8, %6 : i32
    %true = arith.constant true
    %38 = arith.xori %36, %true : i1
    %39 = arith.andi %37, %38 : i1
    %40 = arith.andi %11, %39 : i1
    %41 = arith.extui %40 : i1 to i32
    %c0_i32_17 = arith.constant 0 : i32
    %42 = arith.cmpi ne, %41, %c0_i32_17 : i32
    scf.if %42 {
      %c0_25 = arith.constant 0 : index
      %c0_26 = arith.constant 0 : index
      %60 = vector.load %arg12[%c0_25, %c0_26] : memref<1x128xf32, #tpu.memory_space<vmem>>, vector<1x128xf32>
      %cst_27 = arith.constant dense<0.000000e+00> : vector<128xf32>
      %61 = vector.multi_reduction <add>, %34, %cst_27 [0] : vector<128x128xf32> to vector<128xf32>
      %62 = vector.shape_cast %61 : vector<128xf32> to vector<1x128xf32>
      %63 = arith.addf %60, %62 : vector<1x128xf32>
      %c0_28 = arith.constant 0 : index
      %c0_29 = arith.constant 0 : index
      %64 = vector.load %arg12[%c0_28, %c0_29] : memref<1x128xf32, #tpu.memory_space<vmem>>, vector<1x128xf32>
      tpu.vector_store %arg12[%c0_28, %c0_29], %63 {strides = array<i32>} : memref<1x128xf32, #tpu.memory_space<vmem>>, vector<1x128xf32>,
    } else {
    }
    %true_18 = arith.constant true
    %43 = arith.xori %36, %true_18 : i1
    %44 = arith.andi %35, %43 : i1
    %45 = arith.andi %11, %44 : i1
    %46 = arith.extui %45 : i1 to i32
    %c0_i32_19 = arith.constant 0 : i32
    %47 = arith.cmpi ne, %46, %c0_i32_19 : i32
    scf.if %47 {
      %c0_25 = arith.constant 0 : index
      %c0_26 = arith.constant 0 : index
      %60 = vector.load %arg12[%c0_25, %c0_26] : memref<1x128xf32, #tpu.memory_space<vmem>>, vector<1x128xf32>
      %c0_27 = arith.constant 0 : index
      %c0_28 = arith.constant 0 : index
      %61 = vector.load %arg13[%c0_27, %c0_28] : memref<128x128xf32, #tpu.memory_space<vmem>>, vector<128x128xf32>
      %62 = arith.mulf %34, %61 : vector<128x128xf32>
      %cst_29 = arith.constant dense<0.000000e+00> : vector<128xf32>
      %63 = vector.multi_reduction <add>, %62, %cst_29 [0] : vector<128x128xf32> to vector<128xf32>
      %64 = vector.shape_cast %63 : vector<128xf32> to vector<1x128xf32>
      %65 = arith.addf %60, %64 : vector<1x128xf32>
      %c0_30 = arith.constant 0 : index
      %c0_31 = arith.constant 0 : index
      %66 = vector.load %arg12[%c0_30, %c0_31] : memref<1x128xf32, #tpu.memory_space<vmem>>, vector<1x128xf32>
      tpu.vector_store %arg12[%c0_30, %c0_31], %65 {strides = array<i32>} : memref<1x128xf32, #tpu.memory_space<vmem>>, vector<1x128xf32>,
    } else {
    }
    %true_20 = arith.constant true
    %48 = arith.xori %35, %true_20 : i1
    %49 = arith.andi %48, %36 : i1
    %50 = arith.andi %11, %49 : i1
    %51 = arith.extui %50 : i1 to i32
    %c0_i32_21 = arith.constant 0 : i32
    %52 = arith.cmpi ne, %51, %c0_i32_21 : i32
    scf.if %52 {
      %c0_25 = arith.constant 0 : index
      %c0_26 = arith.constant 0 : index
      %60 = vector.load %arg12[%c0_25, %c0_26] : memref<1x128xf32, #tpu.memory_space<vmem>>, vector<1x128xf32>
      %c0_27 = arith.constant 0 : index
      %c0_28 = arith.constant 0 : index
      %61 = vector.load %arg14[%c0_27, %c0_28] : memref<1x128xf32, #tpu.memory_space<vmem>>, vector<1x128xf32>
      %cst_29 = arith.constant dense<0.000000e+00> : vector<128xf32>
      %62 = vector.multi_reduction <add>, %34, %cst_29 [0] : vector<128x128xf32> to vector<128xf32>
      %63 = vector.shape_cast %62 : vector<128xf32> to vector<1x128xf32>
      %64 = arith.mulf %61, %63 : vector<1x128xf32>
      %65 = arith.addf %60, %64 : vector<1x128xf32>
      %c0_30 = arith.constant 0 : index
      %c0_31 = arith.constant 0 : index
      %66 = vector.load %arg12[%c0_30, %c0_31] : memref<1x128xf32, #tpu.memory_space<vmem>>, vector<1x128xf32>
      tpu.vector_store %arg12[%c0_30, %c0_31], %65 {strides = array<i32>} : memref<1x128xf32, #tpu.memory_space<vmem>>, vector<1x128xf32>,
    } else {
    }
    %53 = arith.andi %35, %36 : i1
    %54 = arith.andi %11, %53 : i1
    %55 = arith.extui %54 : i1 to i32
    %c0_i32_22 = arith.constant 0 : i32
    %56 = arith.cmpi ne, %55, %c0_i32_22 : i32
    scf.if %56 {
      %c0_25 = arith.constant 0 : index
      %c0_26 = arith.constant 0 : index
      %60 = vector.load %arg12[%c0_25, %c0_26] : memref<1x128xf32, #tpu.memory_space<vmem>>, vector<1x128xf32>
      %c0_27 = arith.constant 0 : index
      %c0_28 = arith.constant 0 : index
      %61 = vector.load %arg14[%c0_27, %c0_28] : memref<1x128xf32, #tpu.memory_space<vmem>>, vector<1x128xf32>
      %c0_29 = arith.constant 0 : index
      %c0_30 = arith.constant 0 : index
      %62 = vector.load %arg13[%c0_29, %c0_30] : memref<128x128xf32, #tpu.memory_space<vmem>>, vector<128x128xf32>
      %63 = arith.mulf %34, %62 : vector<128x128xf32>
      %cst_31 = arith.constant dense<0.000000e+00> : vector<128xf32>
      %64 = vector.multi_reduction <add>, %63, %cst_31 [0] : vector<128x128xf32> to vector<128xf32>
      %65 = vector.shape_cast %64 : vector<128xf32> to vector<1x128xf32>
      %66 = arith.mulf %61, %65 : vector<1x128xf32>
      %67 = arith.addf %60, %66 : vector<1x128xf32>
      %c0_32 = arith.constant 0 : index
      %c0_33 = arith.constant 0 : index
      %68 = vector.load %arg12[%c0_32, %c0_33] : memref<1x128xf32, #tpu.memory_space<vmem>>, vector<1x128xf32>
      tpu.vector_store %arg12[%c0_32, %c0_33], %67 {strides = array<i32>} : memref<1x128xf32, #tpu.memory_space<vmem>>, vector<1x128xf32>,
    } else {
    }
    %c0_i32_23 = arith.constant 0 : i32
    %57 = arith.cmpi eq, %arg1, %c0_i32_23 : i32
    %58 = arith.extui %57 : i1 to i32
    %c0_i32_24 = arith.constant 0 : i32
    %59 = arith.cmpi ne, %58, %c0_i32_24 : i32
    scf.if %59 {
      %cst_25 = arith.constant 0.000000e+00 : f32
      %60 = vector.broadcast %cst_25 : f32 to vector<1x8x128xf32>
      %c0_26 = arith.constant 0 : index
      %c0_27 = arith.constant 0 : index
      %c0_28 = arith.constant 0 : index
      %61 = vector.load %arg11[%c0_26, %c0_27, %c0_28] : memref<1x8x128xf32, #tpu.memory_space<vmem>>, vector<1x8x128xf32>
      tpu.vector_store %arg11[%c0_26, %c0_27, %c0_28], %60 {strides = array<i32>} : memref<1x8x128xf32, #tpu.memory_space<vmem>>, vector<1x8x128xf32>,
      %c0_29 = arith.constant 0 : index
      %c0_30 = arith.constant 0 : index
      %62 = vector.load %arg12[%c0_29, %c0_30] : memref<1x128xf32, #tpu.memory_space<vmem>>, vector<1x128xf32>
      %c0_31 = arith.constant 0 : index
      %c0_32 = arith.constant 0 : index
      %c0_33 = arith.constant 0 : index
      %63 = vector.load %arg11[%c0_31, %c0_32, %c0_33] : memref<1x8x128xf32, #tpu.memory_space<vmem>>, vector<1x1x128xf32>
      %64 = vector.shape_cast %63 : vector<1x1x128xf32> to vector<1x128xf32>
      %65 = vector.shape_cast %62 : vector<1x128xf32> to vector<1x1x128xf32>
      tpu.vector_store %arg11[%c0_31, %c0_32, %c0_33], %65 {strides = array<i32>} : memref<1x8x128xf32, #tpu.memory_space<vmem>>, vector<1x1x128xf32>,
    } else {
    }
    return
  }
  func.func @transform_0(%arg0: i32, %arg1: i32, %arg2: memref<1xi32, #tpu.memory_space<smem>>, %arg3: memref<1xi32, #tpu.memory_space<smem>>, %arg4: memref<1xi32, #tpu.memory_space<smem>>) -> (i32, i32) {
    %c1_i32 = arith.constant 1 : i32
    %0 = arith.muli %arg0, %c1_i32 : i32
    %1 = arith.addi %0, %arg1 : i32
    %2 = arith.index_cast %1 : i32 to index
    %3 = memref.load %arg2[%2] : memref<1xi32, #tpu.memory_space<smem>>
    %c0_i32 = arith.constant 0 : i32
    %c0_i32_0 = arith.constant 0 : i32
    return %3, %c0_i32 : i32, i32
  }
  func.func @transform_1(%arg0: i32, %arg1: i32, %arg2: memref<1xi32, #tpu.memory_space<smem>>, %arg3: memref<1xi32, #tpu.memory_space<smem>>, %arg4: memref<1xi32, #tpu.memory_space<smem>>) -> (i32, i32) {
    %c1_i32 = arith.constant 1 : i32
    %0 = arith.muli %arg0, %c1_i32 : i32
    %1 = arith.addi %0, %arg1 : i32
    %2 = arith.index_cast %1 : i32 to index
    %3 = memref.load %arg3[%2] : memref<1xi32, #tpu.memory_space<smem>>
    %c0_i32 = arith.constant 0 : i32
    %c0_i32_0 = arith.constant 0 : i32
    return %3, %c0_i32 : i32, i32
  }
  func.func @transform_2(%arg0: i32, %arg1: i32, %arg2: memref<1xi32, #tpu.memory_space<smem>>, %arg3: memref<1xi32, #tpu.memory_space<smem>>, %arg4: memref<1xi32, #tpu.memory_space<smem>>) -> (i32, i32) {
    %c1_i32 = arith.constant 1 : i32
    %0 = arith.muli %arg0, %c1_i32 : i32
    %1 = arith.addi %0, %arg1 : i32
    %2 = arith.index_cast %1 : i32 to index
    %3 = memref.load %arg2[%2] : memref<1xi32, #tpu.memory_space<smem>>
    %c0_i32 = arith.constant 0 : i32
    %c0_i32_0 = arith.constant 0 : i32
    return %3, %c0_i32 : i32, i32
  }
  func.func @transform_3(%arg0: i32, %arg1: i32, %arg2: memref<1xi32, #tpu.memory_space<smem>>, %arg3: memref<1xi32, #tpu.memory_space<smem>>, %arg4: memref<1xi32, #tpu.memory_space<smem>>) -> (i32, i32) {
    %c1_i32 = arith.constant 1 : i32
    %0 = arith.muli %arg0, %c1_i32 : i32
    %1 = arith.addi %0, %arg1 : i32
    %2 = arith.index_cast %1 : i32 to index
    %3 = memref.load %arg3[%2] : memref<1xi32, #tpu.memory_space<smem>>
    %c0_i32 = arith.constant 0 : i32
    %c0_i32_0 = arith.constant 0 : i32
    return %c0_i32, %3 : i32, i32
  }
  func.func @transform_4(%arg0: i32, %arg1: i32, %arg2: memref<1xi32, #tpu.memory_space<smem>>, %arg3: memref<1xi32, #tpu.memory_space<smem>>, %arg4: memref<1xi32, #tpu.memory_space<smem>>) -> (i32, i32) {
    %c1_i32 = arith.constant 1 : i32
    %0 = arith.muli %arg0, %c1_i32 : i32
    %1 = arith.addi %0, %arg1 : i32
    %2 = arith.index_cast %1 : i32 to index
    %3 = memref.load %arg2[%2] : memref<1xi32, #tpu.memory_space<smem>>
    %c0_i32 = arith.constant 0 : i32
    %c0_i32_0 = arith.constant 0 : i32
    return %3, %c0_i32 : i32, i32
  }
  func.func @transform_5(%arg0: i32, %arg1: i32, %arg2: memref<1xi32, #tpu.memory_space<smem>>, %arg3: memref<1xi32, #tpu.memory_space<smem>>, %arg4: memref<1xi32, #tpu.memory_space<smem>>) -> (i32, i32) {
    %c1_i32 = arith.constant 1 : i32
    %0 = arith.muli %arg0, %c1_i32 : i32
    %1 = arith.addi %0, %arg1 : i32
    %2 = arith.index_cast %1 : i32 to index
    %3 = memref.load %arg3[%2] : memref<1xi32, #tpu.memory_space<smem>>
    %c0_i32 = arith.constant 0 : i32
    %c0_i32_0 = arith.constant 0 : i32
    return %c0_i32, %3 : i32, i32
  }
  func.func @transform_6(%arg0: i32, %arg1: i32, %arg2: memref<1xi32, #tpu.memory_space<smem>>, %arg3: memref<1xi32, #tpu.memory_space<smem>>, %arg4: memref<1xi32, #tpu.memory_space<smem>>) -> (i32, i32, i32) {
    %c0_i32 = arith.constant 0 : i32
    %c0_i32_0 = arith.constant 0 : i32
    %c0_i32_1 = arith.constant 0 : i32
    return %arg0, %c0_i32, %c0_i32_0 : i32, i32, i32
  }
}

</mosaic_0001>

<bundles_post_ra>
// kernel: tpu_custom_call.1
= control target key start
LH: loop header
LB: loop body
LE: loop exit
PB: predicated region body
PF: predicated region fallthrough
CT: control target
= control target key end

     0   :  { %17 = vsyncpa [#allocation10], 0  ;;  %v181_v0 = vlaneseq  ;;  %v1331_v1 = vmov 0.0   ;;  %v1332_v3 = vmov 0   ;;  %s1959_s0 = inlined_call_operand.<no memory space> [shape: s32[1], index: 0, kind: input, shape index: {}]   ;;  %s1960_s1 = inlined_call_operand.<no memory space> [shape: s32[1], index: 1, kind: input, shape index: {}]   ;;  %s1961_s2 = inlined_call_operand.<no memory space> [shape: s32[1], index: 2, kind: input, shape index: {}]   ;;  %s1962_s3 = inlined_call_operand.vmem [shape: f32[128,32], index: 3, kind: input, shape index: {}]   ;;  %s1963_s4 = inlined_call_operand.vmem [shape: f32[128,32], index: 4, kind: input, shape index: {}]   ;;  %s1964_s5 = inlined_call_operand.vmem [shape: f32[128,1], index: 5, kind: input, shape index: {}]   ;;  %s1965_s6 = inlined_call_operand.vmem [shape: f32[1,128], index: 6, kind: input, shape index: {}]   ;;  %s1966_s7 = inlined_call_operand.vmem [shape: s32[128,1], index: 7, kind: input, shape index: {}]   ;;  %s1967_s8 = inlined_call_operand.vmem [shape: s32[1,128], index: 8, kind: input, shape index: {}]   ;;  %s1968_s9 = inlined_call_operand.hbm [shape: f32[1,8,128], index: 9, kind: output, shape index: {}]  }
   0x1   :  { %s1092_s11 = sshll.u32 %s1960_s1, 4  ;;  %180 = vst [vmem:[#allocation2] sm:$0x1] %v1331_v1  ;;  %s1090_s14 = sshll.u32 %s1959_s0, 4  ;;  %1306 = vset.pattern.permute.xlu1 %v1332_v3  ;;  %1305 = vset.pattern.permute.xlu0 %v1332_v3 }
   0x2   :  { %p135_p0 = scmp.lt.s32.totalorder %s1092_s11, 15  ;;  %v182_v2 = vshrl.u32 %v181_v0, 7  ;;  %p125_p1 = scmp.lt.s32.totalorder %s1090_s14, 15  ;;  %v1391_v4 = vand.u32 127, %v181_v0 }
   0x3   :  { %p849_p2 = scmp.gt.s32.totalorder %s1960_s1, %s1959_s0  ;;  %p850_p3 = scmp.ne.s32.totalorder %s1960_s1, 0 }
   0x4   :  { %s1990_s11 = smov (!%p135_p0, %s1092_s11), 15  ;;  %v183_v5 = vadd.s32 8, %v182_v2  ;;  %v184_v6 = vadd.s32 16, %v182_v2  ;;  %v185_v7 = vadd.s32 24, %v182_v2  ;;  %v186_v8 = vadd.s32 32, %v182_v2  ;;  %s1992_s14 = smov (!%p125_p1, %s1090_s14), 15 }
   0x5   :  { %s1093_s15 = sshll.u32 %s1990_s11, 3  ;;  %v187_v9 = vadd.s32 40, %v182_v2  ;;  %v188_v10 = vadd.s32 48, %v182_v2  ;;  %v189_v11 = vadd.s32 56, %v182_v2  ;;  %v190_v12 = vadd.s32 64, %v182_v2  ;;  %s1393_s16 = sshll.u32 %s1992_s14, 3 }
   0x6   :  { %v191_v13 = vadd.s32 72, %v182_v2  ;;  %v192_v14 = vadd.s32 80, %v182_v2  ;;  %v193_v15 = vadd.s32 88, %v182_v2  ;;  %v194_v16 = vadd.s32 96, %v182_v2  ;;  %s1399_s19 = scalar_lea.vmem %s1963_s4, %s1093_s15  ;;  %s1409_s22 = scalar_lea.vmem %s1964_s5, %s1393_s16 }
   0x7   :  { %v195_v17 = vadd.s32 104, %v182_v2  ;;  %v196_v18 = vadd.s32 112, %v182_v2  ;;  %v197_v19 = vadd.s32 120, %v182_v2  ;;  %vm200_vm1 = vcmp.gt.s32.totalorder %v1391_v4, %v182_v2  ;;  %v289_v21 = vld [vmem:[%s1399_s19] sm:$0xff]  ;;  %v290_v22 = vld [vmem:[%s1399_s19 + $0x8] sm:$0xff]  ;;  %v549_v23 = vld [vmem:[%s1409_s22 + $0x10] sm:$0xff]  ;;  %s1490_s23 = scalar_lea.vmem %s1962_s3, %s1393_s16  ;;  %s1546_s25 = scalar_lea.vmem %s1966_s7, %s1393_s16 }
   0x8   :  { %vm201_vm2 = vcmp.gt.s32.totalorder %v1391_v4, %v183_v5  ;;  %vm202_vm3 = vcmp.gt.s32.totalorder %v1391_v4, %v184_v6  ;;  %vm203_vm4 = vcmp.gt.s32.totalorder %v1391_v4, %v185_v7  ;;  %vm204_vm5 = vcmp.gt.s32.totalorder %v1391_v4, %v186_v8  ;;  %v547_v24 = vld [vmem:[%s1409_s22] sm:$0xff]  ;;  %v291_v29 = vld [vmem:[%s1399_s19 + $0x10] sm:$0xff]  ;;  %v292_v30 = vld [vmem:[%s1399_s19 + $0x18] sm:$0xff]  ;;  %576 = vperm.xlu1 %1306, %v549_v23   ;;  %p1115_p4 = scmp.gt.s32.totalorder %s1961_s2, 0  ;;  %p851_p5 = pnand %p850_p3, %p849_p2 }
   0x9   :  { %vm205_vm6 = vcmp.gt.s32.totalorder %v1391_v4, %v187_v9  ;;  %vm206_vm7 = vcmp.gt.s32.totalorder %v1391_v4, %v188_v10  ;;  %vm207_vm8 = vcmp.gt.s32.totalorder %v1391_v4, %v189_v11  ;;  %vm208_vm9 = vcmp.gt.s32.totalorder %v1391_v4, %v190_v12  ;;  %566 = vperm.xlu0 %1305, %v547_v24   ;;  %v550_v35 = vld [vmem:[%s1409_s22 + $0x18] sm:$0xff]  ;;  %v548_v36 = vld [vmem:[%s1409_s22 + $0x8] sm:$0xff]  ;;  %v551_v49 = vld [vmem:[%s1409_s22 + $0x20] sm:$0xff]  ;;  %p847_p7 = scmp.eq.s32.totalorder %s1959_s0, %s1960_s1  ;;  %p848_p8 = scmp.eq.s32.totalorder %s1960_s1, 0 }
   0xa   :  { %vm209_vm10 = vcmp.gt.s32.totalorder %v1391_v4, %v191_v13  ;;  %vm210_vm11 = vcmp.gt.s32.totalorder %v1391_v4, %v192_v14  ;;  %vm211_vm12 = vcmp.gt.s32.totalorder %v1391_v4, %v193_v15  ;;  %vm212_vm13 = vcmp.gt.s32.totalorder %v1391_v4, %v194_v16  ;;  %v552_v48 = vld [vmem:[%s1409_s22 + $0x28] sm:$0xff]  ;;  %v273_v50 = vld [vmem:[%s1490_s23] sm:$0xff]  ;;  %v554_v54 = vld [vmem:[%s1409_s22 + $0x38] sm:$0xff]  ;;  %p852_p6 = pneg %p851_p5  ;;  %p154_p10 = scmp.lt.s32.totalorder %s1960_s1, 0 }
   0xb   :  { %vm213_vm14 = vcmp.gt.s32.totalorder %v1391_v4, %v195_v17  ;;  %vm214_vm15 = vcmp.gt.s32.totalorder %v1391_v4, %v196_v18  ;;  %vm215_vm0 = vcmp.gt.s32.totalorder %v1391_v4, %v197_v19  ;;  %v1098_v20 = vsel %vm200_vm1, 1.0, %v1331_v1  ;;  %v281_v51 = vld [vmem:[%s1490_s23 + $0x40] sm:$0xff]  ;;  %v294_v53 = vld [vmem:[%s1399_s19 + $0x28] sm:$0xff]  ;;  %v553_v55 = vld [vmem:[%s1409_s22 + $0x30] sm:$0xff] }
   0xc   :  { %v1099_v25 = vsel %vm201_vm2, 1.0, %v1331_v1  ;;  %v1100_v26 = vsel %vm202_vm3, 1.0, %v1331_v1  ;;  %v1101_v27 = vsel %vm203_vm4, 1.0, %v1331_v1  ;;  %v1102_v28 = vsel %vm204_vm5, 1.0, %v1331_v1  ;;  %248 = vst [vmem:[#allocation3] sm:$0xff] %v1098_v20  ;;  %581 = vperm.xlu1 %1306, %v550_v35   ;;  %v293_v52 = vld [vmem:[%s1399_s19 + $0x20] sm:$0xff]  ;;  %p1663_p9 = pnand %p1115_p4, %p852_p6 }
   0xd   :  { %v1103_v31 = vsel %vm205_vm6, 1.0, %v1331_v1  ;;  %v1104_v32 = vsel %vm206_vm7, 1.0, %v1331_v1  ;;  %v1105_v33 = vsel %vm207_vm8, 1.0, %v1331_v1  ;;  %v1106_v34 = vsel %vm208_vm9, 1.0, %v1331_v1  ;;  %249 = vst [vmem:[#allocation3 + $0x8] sm:$0xff] %v1099_v25  ;;  %250 = vst [vmem:[#allocation3 + $0x10] sm:$0xff] %v1100_v26  ;;  %571 = vperm.xlu0 %1305, %v548_v36  }
   0xe   :  { %251 = vst [vmem:[#allocation3 + $0x18] sm:$0xff] %v1101_v27  ;;  %252 = vst [vmem:[#allocation3 + $0x20] sm:$0xff] %v1102_v28  ;;  %v1107_v37 = vsel %vm209_vm10, 1.0, %v1331_v1  ;;  %v1108_v38 = vsel %vm210_vm11, 1.0, %v1331_v1  ;;  %v1109_v39 = vsel %vm211_vm12, 1.0, %v1331_v1  ;;  %v1110_v40 = vsel %vm212_vm13, 1.0, %v1331_v1 }
   0xf   :  { %253 = vst [vmem:[#allocation3 + $0x28] sm:$0xff] %v1103_v31  ;;  %254 = vst [vmem:[#allocation3 + $0x30] sm:$0xff] %v1104_v32  ;;  %v1111_v41 = vsel %vm213_vm14, 1.0, %v1331_v1  ;;  %v1112_v42 = vsel %vm214_vm15, 1.0, %v1331_v1  ;;  %v1113_v43 = vsel %vm215_vm0, 1.0, %v1331_v1  ;;  %vm264_vm1 = vcmp.lt.s32.totalorder %v1391_v4, 8 }
  0x10   :  { %255 = vst [vmem:[#allocation3 + $0x38] sm:$0xff] %v1105_v33  ;;  %256 = vst [vmem:[#allocation3 + $0x40] sm:$0xff] %v1106_v34  ;;  %vm1969_vm2 = vcmask 261120   ;;  %v1114_v45 = vsel %vm264_vm1, 1.0, %v1331_v1  ;;  %v1238_v46 = vpack.c.bf16 %v290_v22, %v289_v21  ;;  %v1244_v47 = vpack.c.bf16 %v292_v30, %v291_v29  ;;  %591 = vperm.xlu1 %1306, %v552_v48   ;;  %v556_v57 = vld [vmem:[%s1409_s22 + $0x48] sm:$0xff]  ;;  %v555_v58 = vld [vmem:[%s1409_s22 + $0x40] sm:$0xff] }
  0x11   :  { %257 = vst [vmem:[#allocation3 + $0x48] sm:$0xff] %v1107_v37  ;;  %258 = vst [vmem:[#allocation3 + $0x50] sm:$0xff] %v1108_v38  ;;  %586 = vperm.xlu0 %1305, %v551_v49   ;;  %v1250_v56 = vpack.c.bf16 %v294_v53, %v293_v52  ;;  %v295_v59 = vld [vmem:[%s1399_s19 + $0x30] sm:$0xff]  ;;  %v296_v60 = vld [vmem:[%s1399_s19 + $0x38] sm:$0xff]  ;;  %s155_s24 = scalar_select %p154_p10, %s1960_s1, 0 }
  0x12   :  { %259 = vst [vmem:[#allocation3 + $0x58] sm:$0xff] %v1109_v39  ;;  %260 = vst [vmem:[#allocation3 + $0x60] sm:$0xff] %v1110_v40  ;;  %v558_v61 = vld [vmem:[%s1409_s22 + $0x58] sm:$0xff]  ;;  %v557_v62 = vld [vmem:[%s1409_s22 + $0x50] sm:$0xff]  ;;  %v1256_v63 = vpack.c.bf16 %v296_v60, %v295_v59 }
  0x13   :  { %vm1481_vm3 = vmpackc.low %vm1969_vm2, %vm1969_vm2  ;;  %261 = vst [vmem:[#allocation3 + $0x68] sm:$0xff] %v1111_v41  ;;  %v560_v0 = vld [vmem:[%s1409_s22 + $0x68] sm:$0xff]  ;;  %v559_v2 = vld [vmem:[%s1409_s22 + $0x60] sm:$0xff]  ;;  %s156_s26 = scalar_lea.vmem %s1965_s6, %s155_s24  ;;  %s173_s29 = scalar_lea.vmem %s1967_s8, %s155_s24 }
  0x14   :  { %262 = vst [vmem:[#allocation3 + $0x70] sm:$0xff] %v1112_v42  ;;  %263 = vst [vmem:[#allocation3 + $0x78] sm:$0xff] %v1113_v43  ;;  %1240 = vmatprep.subr.msk.bf16.mxu0 %vm1481_vm3, %v1238_v46  ;;  %1286 = vmatprep.subr.msk.bf16.mxu1 %vm1481_vm3, %v1238_v46  ;;  %v297_v3 = vld [vmem:[%s1399_s19 + $0x40] sm:$0xff]  ;;  %v298_v4 = vld [vmem:[%s1399_s19 + $0x48] sm:$0xff] }
  0x15   :  { %267 = vst [vmem:[#allocation4] sm:$0x1] %v1114_v45  ;;  %1243 = vmatpush3.bf16.xpose.msk.msra.mxu0 %vm1481_vm3, %v1238_v46  ;;  %1294 = vmatpush3.bf16.xpose.msk.msra.mxu1 %vm1481_vm3, %v1238_v46  ;;  %vm1972_vm0 = vmmov %vm1969_vm2  ;;  %v562_v5 = vld [vmem:[%s1409_s22 + $0x78] sm:$0xff]  ;;  %v561_v6 = vld [vmem:[%s1409_s22 + $0x70] sm:$0xff]  ;;  %v1262_v7 = vpack.c.bf16 %v298_v4, %v297_v3 }
  0x16   :  { %1246 = vmatprep.subr.msk.bf16.mxu0 %vm1481_vm3, %v1244_v47  ;;  %1287 = vmatprep.subr.msk.bf16.mxu1 %vm1481_vm3, %v1244_v47  ;;  %vm1973_vm4 = vmmov %vm1972_vm0  ;;  %v699_v8 = vld [vmem:[%s1546_s25 + $0x8] sm:$0xff]  ;;  %v698_v9 = vld [vmem:[%s1546_s25] sm:$0xff] }
  0x17   :  { %1214 = vmatprep.mubr.msk.f32.mxu0 %vm1972_vm0, %v273_v50  ;;  %1226 = vmatprep.mubr.msk.f32.mxu1 %vm1973_vm4, %v281_v51  ;;  %v299_v10 = vld [vmem:[%s1399_s19 + $0x50] sm:$0xff]  ;;  %v300_v11 = vld [vmem:[%s1399_s19 + $0x58] sm:$0xff]  ;;  %v703_v15 = vld [vmem:[%s1546_s25 + $0x28] sm:$0xff] }
  0x18   :  { %601 = vperm.xlu1 %1306, %v554_v54   ;;  %596 = vperm.xlu0 %1305, %v553_v55   ;;  %v701_v12 = vld [vmem:[%s1546_s25 + $0x18] sm:$0xff]  ;;  %v700_v13 = vld [vmem:[%s1546_s25 + $0x10] sm:$0xff]  ;;  %v1268_v14 = vpack.c.bf16 %v300_v11, %v299_v10  ;;  %v702_v16 = vld [vmem:[%s1546_s25 + $0x20] sm:$0xff] }
  0x19   :  { %v301_v17 = vld [vmem:[%s1399_s19 + $0x60] sm:$0xff]  ;;  %v302_v18 = vld [vmem:[%s1399_s19 + $0x68] sm:$0xff]  ;;  %v705_v19 = vld [vmem:[%s1546_s25 + $0x38] sm:$0xff] }
  0x1a   :  { %v704_v20 = vld [vmem:[%s1546_s25 + $0x30] sm:$0xff]  ;;  %v1274_v21 = vpack.c.bf16 %v302_v18, %v301_v17  ;;  %v707_v22 = vld [vmem:[%s1546_s25 + $0x48] sm:$0xff]  ;;  %v706_v23 = vld [vmem:[%s1546_s25 + $0x40] sm:$0xff] }
  0x1b   :  { %v303_v24 = vld [vmem:[%s1399_s19 + $0x70] sm:$0xff]  ;;  %v304_v25 = vld [vmem:[%s1399_s19 + $0x78] sm:$0xff]  ;;  %v711_v29 = vld [vmem:[%s1546_s25 + $0x68] sm:$0xff] }
  0x1c   :  { %611 = vperm.xlu1 %1306, %v556_v57   ;;  %606 = vperm.xlu0 %1305, %v555_v58   ;;  %v709_v26 = vld [vmem:[%s1546_s25 + $0x58] sm:$0xff]  ;;  %v708_v27 = vld [vmem:[%s1546_s25 + $0x50] sm:$0xff]  ;;  %v1280_v28 = vpack.c.bf16 %v304_v25, %v303_v24  ;;  %v710_v30 = vld [vmem:[%s1546_s25 + $0x60] sm:$0xff] }
  0x1d   :  { %1249 = vmatpush3.bf16.xpose.msk.msra.mxu0 %vm1481_vm3, %v1244_v47  ;;  %1295 = vmatpush3.bf16.xpose.msk.msra.mxu1 %vm1481_vm3, %v1244_v47  ;;  %v713_v31 = vld [vmem:[%s1546_s25 + $0x78] sm:$0xff]  ;;  %v712_v32 = vld [vmem:[%s1546_s25 + $0x70] sm:$0xff]  ;;  %v274_v33 = vld [vmem:[%s1490_s23 + $0x8] sm:$0xff] }
  0x1e   :  { %1252 = vmatprep.subr.msk.bf16.mxu0 %vm1481_vm3, %v1250_v56  ;;  %1288 = vmatprep.subr.msk.bf16.mxu1 %vm1481_vm3, %v1250_v56  ;;  %v282_v34 = vld [vmem:[%s1490_s23 + $0x48] sm:$0xff]  ;;  %v275_v35 = vld [vmem:[%s1490_s23 + $0x10] sm:$0xff]  ;;  %vm1974_vm5 = vmmov %vm1972_vm0 }
  0x1f   :  { %v283_v36 = vld [vmem:[%s1490_s23 + $0x50] sm:$0xff]  ;;  %vm1975_vm6 = vmmov %vm1972_vm0  ;;  %v276_v37 = vld [vmem:[%s1490_s23 + $0x18] sm:$0xff] }
  0x20   :  { %621 = vperm.xlu1 %1306, %v558_v61   ;;  %616 = vperm.xlu0 %1305, %v557_v62   ;;  %vm1976_vm7 = vmmov %vm1972_vm0  ;;  %v284_v38 = vld [vmem:[%s1490_s23 + $0x58] sm:$0xff]  ;;  %v277_v39 = vld [vmem:[%s1490_s23 + $0x20] sm:$0xff] }
  0x21   :  { %vm1977_vm8 = vmmov %vm1972_vm0  ;;  %v285_v40 = vld [vmem:[%s1490_s23 + $0x60] sm:$0xff]  ;;  %v278_v41 = vld [vmem:[%s1490_s23 + $0x28] sm:$0xff] }
  0x22   :  { %vm1978_vm9 = vmmov %vm1972_vm0  ;;  %v286_v42 = vld [vmem:[%s1490_s23 + $0x68] sm:$0xff]  ;;  %v279_v43 = vld [vmem:[%s1490_s23 + $0x30] sm:$0xff] }
  0x23   :  { %vm1979_vm10 = vmmov %vm1972_vm0  ;;  %v287_v44 = vld [vmem:[%s1490_s23 + $0x70] sm:$0xff]  ;;  %v280_v45 = vld [vmem:[%s1490_s23 + $0x38] sm:$0xff] }
  0x24   :  { %631 = vperm.xlu1 %1306, %v560_v0   ;;  %626 = vperm.xlu0 %1305, %v559_v2   ;;  %vm1980_vm11 = vmmov %vm1972_vm0  ;;  %v288_v46 = vld [vmem:[%s1490_s23 + $0x78] sm:$0xff]  ;;  %v1711_v24 = vld [vmem:[%s173_s29] ss:$0 sm:$0xff] }
  0x25   :  { %1255 = vmatpush3.bf16.xpose.msk.msra.mxu0 %vm1481_vm3, %v1250_v56  ;;  %1296 = vmatpush3.bf16.xpose.msk.msra.mxu1 %vm1481_vm3, %v1250_v56  ;;  %vm1981_vm12 = vmmov %vm1972_vm0 }
  0x26   :  { %1258 = vmatprep.subr.msk.bf16.mxu0 %vm1481_vm3, %v1256_v63  ;;  %1289 = vmatprep.subr.msk.bf16.mxu1 %vm1481_vm3, %v1256_v63  ;;  %vm1982_vm13 = vmmov %vm1972_vm0 }
  0x27   :  { %vm1983_vm14 = vmmov %vm1972_vm0 }
  0x28   :  { %641 = vperm.xlu1 %1306, %v562_v5   ;;  %636 = vperm.xlu0 %1305, %v561_v6   ;;  %vm1984_vm15 = vmmov %vm1972_vm0 }
  0x29   :  { %vm1985_vm1 = vmmov %vm1972_vm0 }
  0x2a   :  { %vm1986_vm2 = vmmov %vm1972_vm0 }
  0x2c   :  { %719 = vperm.xlu1 %1306, %v699_v8   ;;  %716 = vperm.xlu0 %1305, %v698_v9   ;;  %v1148_v9 = vld [vmem:[%s156_s26] ss:$0 sm:$0xff] }
  0x2d   :  { %1261 = vmatpush3.bf16.xpose.msk.msra.mxu0 %vm1481_vm3, %v1256_v63  ;;  %1297 = vmatpush3.bf16.xpose.msk.msra.mxu1 %vm1481_vm3, %v1256_v63 }
  0x2e   :  { %1264 = vmatprep.subr.msk.bf16.mxu0 %vm1481_vm3, %v1262_v7  ;;  %1290 = vmatprep.subr.msk.bf16.mxu1 %vm1481_vm3, %v1262_v7 }
  0x30   :  { %725 = vperm.xlu1 %1306, %v701_v12   ;;  %722 = vperm.xlu0 %1305, %v700_v13  }
  0x34   :  { %731 = vperm.xlu1 %1306, %v703_v15   ;;  %728 = vperm.xlu0 %1305, %v702_v16  }
  0x35   :  { %1267 = vmatpush3.bf16.xpose.msk.msra.mxu0 %vm1481_vm3, %v1262_v7  ;;  %1298 = vmatpush3.bf16.xpose.msk.msra.mxu1 %vm1481_vm3, %v1262_v7 }
  0x36   :  { %1270 = vmatprep.subr.msk.bf16.mxu0 %vm1481_vm3, %v1268_v14  ;;  %1291 = vmatprep.subr.msk.bf16.mxu1 %vm1481_vm3, %v1268_v14 }
  0x38   :  { %737 = vperm.xlu1 %1306, %v705_v19   ;;  %734 = vperm.xlu0 %1305, %v704_v20  }
  0x3c   :  { %743 = vperm.xlu1 %1306, %v707_v22   ;;  %740 = vperm.xlu0 %1305, %v706_v23  }
  0x3d   :  { %1273 = vmatpush3.bf16.xpose.msk.msra.mxu0 %vm1481_vm3, %v1268_v14  ;;  %1299 = vmatpush3.bf16.xpose.msk.msra.mxu1 %vm1481_vm3, %v1268_v14 }
  0x3e   :  { %1276 = vmatprep.subr.msk.bf16.mxu0 %vm1481_vm3, %v1274_v21  ;;  %1292 = vmatprep.subr.msk.bf16.mxu1 %vm1481_vm3, %v1274_v21 }
  0x40   :  { %749 = vperm.xlu1 %1306, %v709_v26   ;;  %746 = vperm.xlu0 %1305, %v708_v27  }
  0x44   :  { %755 = vperm.xlu1 %1306, %v711_v29   ;;  %752 = vperm.xlu0 %1305, %v710_v30  }
  0x45   :  { %1279 = vmatpush3.bf16.xpose.msk.msra.mxu0 %vm1481_vm3, %v1274_v21  ;;  %1300 = vmatpush3.bf16.xpose.msk.msra.mxu1 %vm1481_vm3, %v1274_v21 }
  0x46   :  { %1282 = vmatprep.subr.msk.bf16.mxu0 %vm1481_vm3, %v1280_v28  ;;  %1293 = vmatprep.subr.msk.bf16.mxu1 %vm1481_vm3, %v1280_v28 }
  0x48   :  { %761 = vperm.xlu1 %1306, %v713_v31   ;;  %758 = vperm.xlu0 %1305, %v712_v32  }
  0x4d   :  { %1285 = vmatpush3.bf16.xpose.msk.msra.mxu0 %vm1481_vm3, %v1280_v28  ;;  %1301 = vmatpush3.bf16.xpose.msk.msra.mxu1 %vm1481_vm3, %v1280_v28  ;;  %vm1987_vm3 = vmmov %vm1972_vm0 }
  0x54   :  { %1215 = vmatmul.mubr.msk.f32.vlgmr.msra.gmra.mrb[0].mxu0 %vm1974_vm5, %v274_v33  ;;  %1227 = vmatmul.mubr.msk.f32.vlgmr.msra.gmra.mrb[0].mxu1 %vm1975_vm6, %v282_v34 }
  0x55   :  { %1217 = vmatprep.mubr.msk.f32.mxu0 %vm1976_vm7, %v275_v35  ;;  %1229 = vmatprep.mubr.msk.f32.mxu1 %vm1977_vm8, %v283_v36 }
  0x58   :  { %1218 = vmatmul.mubr.msk.f32.gmra.mrb[2].mxu0 %vm1978_vm9, %v276_v37  ;;  %1230 = vmatmul.mubr.msk.f32.gmra.mrb[2].mxu1 %vm1979_vm10, %v284_v38 }
  0x59   :  { %1220 = vmatprep.mubr.msk.f32.mxu0 %vm1980_vm11, %v277_v39  ;;  %1232 = vmatprep.mubr.msk.f32.mxu1 %vm1981_vm12, %v285_v40 }
  0x5c   :  { %1221 = vmatmul.mubr.msk.f32.gmra.mrb[4].mxu0 %vm1982_vm13, %v278_v41  ;;  %1233 = vmatmul.mubr.msk.f32.gmra.mrb[4].mxu1 %vm1983_vm14, %v286_v42 }
  0x5d   :  { %1223 = vmatprep.mubr.msk.f32.mxu0 %vm1984_vm15, %v279_v43  ;;  %1235 = vmatprep.mubr.msk.f32.mxu1 %vm1985_vm1, %v287_v44 }
  0x60   :  { %1224 = vmatmul.mubr.msk.f32.gmra.mrb[6].mxu0 %vm1986_vm2, %v280_v45  ;;  %1236 = vmatmul.mubr.msk.f32.gmra.mrb[6].mxu1 %vm1987_vm3, %v288_v46 }
  0x87   :  { %v577_v47 = vpop.permute.xlu1 %576 }
  0x88   :  { %v567_v48 = vpop.permute.xlu0 %566  ;;  %v1695_v10 = vadd.f32 %v1148_v9, %v577_v47 }
  0x89   :  { %v650_v11 = vadd.f32 %v1148_v9, %v567_v48 }
  0x8b   :  { %v582_v49 = vpop.permute.xlu1 %581 }
  0x8c   :  { %v572_v50 = vpop.permute.xlu0 %571  ;;  %v1697_v12 = vadd.f32 %v1148_v9, %v582_v49 }
  0x8d   :  { %v651_v13 = vadd.f32 %v1148_v9, %v572_v50 }
  0x8f   :  { %v592_v51 = vpop.permute.xlu1 %591 }
  0x90   :  { %v587_v52 = vpop.permute.xlu0 %586  ;;  %v1699_v14 = vadd.f32 %v1148_v9, %v592_v51 }
  0x91   :  { %v1701_v15 = vadd.f32 %v1148_v9, %v587_v52 }
  0x97   :  { %v602_v53 = vpop.permute.xlu1 %601  ;;  %v597_v54 = vpop.permute.xlu0 %596 }
  0x98   :  { %v1703_v16 = vadd.f32 %v1148_v9, %v602_v53  ;;  %v1705_v17 = vadd.f32 %v1148_v9, %v597_v54 }
  0x9b   :  { %v612_v55 = vpop.permute.xlu1 %611  ;;  %v607_v56 = vpop.permute.xlu0 %606 }
  0x9c   :  { %v659_v20 = vadd.f32 %v1148_v9, %v612_v55  ;;  %v658_v21 = vadd.f32 %v1148_v9, %v607_v56 }
  0x9f   :  { %v622_v57 = vpop.permute.xlu1 %621  ;;  %v617_v58 = vpop.permute.xlu0 %616 }
  0xa0   :  { %v661_v22 = vadd.f32 %v1148_v9, %v622_v57  ;;  %v1709_v23 = vadd.f32 %v1148_v9, %v617_v58 }
  0xa3   :  { %v632_v59 = vpop.permute.xlu1 %631  ;;  %v627_v60 = vpop.permute.xlu0 %626 }
  0xa4   :  { %v1713_v27 = vadd.f32 %v1148_v9, %v632_v59  ;;  %v1715_v28 = vadd.f32 %v1148_v9, %v627_v60 }
  0xa7   :  { %v642_v61 = vpop.permute.xlu1 %641  ;;  %v637_v62 = vpop.permute.xlu0 %636 }
  0xa8   :  { %v1717_v33 = vadd.f32 %v1148_v9, %v642_v61  ;;  %v1719_v34 = vadd.f32 %v1148_v9, %v637_v62 }
  0xab   :  { %v1667_v63 = vpop.permute.xlu1 %719  ;;  %v1669_v0 = vpop.permute.xlu0 %716 }
  0xac   :  { %vm768_vm0 = vcmp.eq.s32.totalorder %v1667_v63, %v1711_v24  ;;  %vm767_vm4 = vcmp.eq.s32.totalorder %v1669_v0, %v1711_v24 }
  0xaf   :  { %v1671_v2 = vpop.permute.xlu1 %725  ;;  %v1673_v3 = vpop.permute.xlu0 %722 }
  0xb0   :  { %vm770_vm5 = vcmp.eq.s32.totalorder %v1671_v2, %v1711_v24  ;;  %vm769_vm9 = vcmp.eq.s32.totalorder %v1673_v3, %v1711_v24 }
  0xb3   :  { %v1675_v4 = vpop.permute.xlu1 %731  ;;  %v1680_v5 = vpop.permute.xlu0 %728 }
  0xb4   :  { %vm772_vm11 = vcmp.eq.s32.totalorder %v1675_v4, %v1711_v24  ;;  %vm771_vm13 = vcmp.eq.s32.totalorder %v1680_v5, %v1711_v24 }
  0xb7   :  { %v1682_v6 = vpop.permute.xlu1 %737  ;;  %v1690_v7 = vpop.permute.xlu0 %734 }
  0xb8   :  { %vm774_vm15 = vcmp.eq.s32.totalorder %v1682_v6, %v1711_v24  ;;  %vm773_vm1 = vcmp.eq.s32.totalorder %v1690_v7, %v1711_v24 }
  0xbb   :  { %v744_v8 = vpop.permute.xlu1 %743  ;;  %v741_v18 = vpop.permute.xlu0 %740 }
  0xbc   :  { %vm776_vm6 = vcmp.eq.s32.totalorder %v744_v8, %v1711_v24  ;;  %vm775_vm7 = vcmp.eq.s32.totalorder %v741_v18, %v1711_v24 }
  0xbf   :  { %v1707_v19 = vpop.permute.xlu1 %749  ;;  %v1731_v46 = vpop.permute.xlu0 %746 }
  0xc0   :  { %vm778_vm8 = vcmp.eq.s32.totalorder %v1707_v19, %v1711_v24  ;;  %vm777_vm10 = vcmp.eq.s32.totalorder %v1731_v46, %v1711_v24 }
  0xc3   :  { %v1735_v50 = vpop.permute.xlu1 %755 }
  0xc4   :  { %vm780_vm12 = vcmp.eq.s32.totalorder %v1735_v50, %v1711_v24 }
 0x127   :  { %v1216_v25 = vpop.f32.mrb[0].mxu0  ;;  %v1228_v26 = vpop.f32.mrb[0].mxu1 }
 0x128   :  { %v667_v29 = vmul.f32 2.0, %v1216_v25  ;;  %v675_v30 = vmul.f32 2.0, %v1228_v26  ;;  %v468_v31 = vpop.f32.mrb[1].mxu0  ;;  %v508_v32 = vpop.f32.mrb[1].mxu1 }
 0x129   :  { %v666_v35 = vmul.f32 2.0, %v468_v31  ;;  %v674_v36 = vmul.f32 2.0, %v508_v32 }
 0x12a   :  { %v683_v37 = vsub.f32 %v651_v13, %v667_v29  ;;  %v691_v38 = vsub.f32 %v659_v20, %v675_v30 }
 0x12b   :  { %v682_v39 = vsub.f32 %v650_v11, %v666_v35  ;;  %v690_v40 = vsub.f32 %v658_v21, %v674_v36  ;;  %v1219_v41 = vpop.f32.mrb[2].mxu0  ;;  %v1231_v42 = vpop.f32.mrb[2].mxu1 }
 0x12c   :  { %v784_v43 = vadd.f32 -0.39, %v683_v37  ;;  %v800_v44 = vsub.f32 0.49, %v683_v37  ;;  %v792_v45 = vadd.f32 -0.39, %v691_v38 }
 0x12d   :  { %v808_v47 = vsub.f32 0.49, %v691_v38  ;;  %v783_v48 = vadd.f32 -0.39, %v682_v39  ;;  %v799_v49 = vsub.f32 0.49, %v682_v39 }
 0x12e   :  { %v816_v51 = vsel %vm768_vm0, %v784_v43, %v800_v44  ;;  %v791_v52 = vadd.f32 -0.39, %v690_v40  ;;  %v807_v53 = vsub.f32 0.49, %v690_v40  ;;  %v669_v54 = vmul.f32 2.0, %v1219_v41  ;;  %v478_v55 = vpop.f32.mrb[3].mxu0  ;;  %v753_v44 = vpop.permute.xlu0 %752 }
 0x12f   :  { %v1742_v56 = vmax.f32 %v816_v51, 0.0  ;;  %v824_v57 = vsel %vm776_vm6, %v792_v45, %v808_v47  ;;  %v815_v58 = vsel %vm767_vm4, %v783_v48, %v799_v49  ;;  %v677_v59 = vmul.f32 2.0, %v1231_v42  ;;  %v518_v60 = vpop.f32.mrb[3].mxu1  ;;  %v1222_v61 = vpop.f32.mrb[4].mxu0 }
 0x130   :  { %v1751_v62 = vmax.f32 %v824_v57, 0.0  ;;  %v1753_v63 = vmax.f32 %v815_v58, 0.0  ;;  %v823_v9 = vsel %vm775_vm7, %v791_v52, %v807_v53  ;;  %v685_v8 = vsub.f32 %v1697_v12, %v669_v54  ;;  %v1234_v11 = vpop.f32.mrb[4].mxu1  ;;  %v488_v13 = vpop.f32.mrb[5].mxu0 }
 0x131   :  { %v1760_v0 = vmax.f32 %v823_v9, 0.0  ;;  %v693_v20 = vsub.f32 %v661_v22, %v677_v59  ;;  %v668_v21 = vmul.f32 2.0, %v478_v55  ;;  %v676_v25 = vmul.f32 2.0, %v518_v60  ;;  %v528_v26 = vpop.f32.mrb[5].mxu1  ;;  %v762_v60 = vpop.permute.xlu1 %761 }
 0x132   :  { %v786_v29 = vadd.f32 -0.39, %v685_v8  ;;  %v802_v30 = vsub.f32 0.49, %v685_v8  ;;  %v671_v18 = vmul.f32 2.0, %v1222_v61  ;;  %v679_v31 = vmul.f32 2.0, %v1234_v11 }
 0x133   :  { %v794_v32 = vadd.f32 -0.39, %v693_v20  ;;  %v810_v12 = vsub.f32 0.49, %v693_v20  ;;  %v684_v35 = vsub.f32 %v1695_v10, %v668_v21  ;;  %v692_v36 = vsub.f32 %v1709_v23, %v676_v25  ;;  %v1225_v37 = vpop.f32.mrb[6].mxu0  ;;  %v1237_v38 = vpop.f32.mrb[6].mxu1 }
 0x134   :  { %v818_v22 = vsel %vm770_vm5, %v786_v29, %v802_v30  ;;  %v687_v39 = vsub.f32 %v1699_v14, %v671_v18  ;;  %v695_v40 = vsub.f32 %v1713_v27, %v679_v31  ;;  %v670_v41 = vmul.f32 2.0, %v488_v13  ;;  %v498_v42 = vpop.f32.mrb[7].mxu0  ;;  %v538_v43 = vpop.f32.mrb[7].mxu1 }
 0x135   :  { %v1771_v45 = vmax.f32 %v818_v22, 0.0  ;;  %v826_v10 = vsel %vm778_vm8, %v794_v32, %v810_v12  ;;  %v785_v23 = vadd.f32 -0.39, %v684_v35  ;;  %v801_v47 = vsub.f32 0.49, %v684_v35  ;;  %v759_v31 = vpop.permute.xlu0 %758 }
 0x136   :  { %vm779_vm14 = vcmp.eq.s32.totalorder %v753_v44, %v1711_v24  ;;  %v1777_v2 = vmax.f32 %v826_v10, 0.0  ;;  %v793_v48 = vadd.f32 -0.39, %v692_v36  ;;  %v809_v14 = vsub.f32 0.49, %v692_v36 }
 0x137   :  { %v686_v27 = vsub.f32 %v1701_v15, %v670_v41  ;;  %v817_v49 = vsel %vm769_vm9, %v785_v23, %v801_v47  ;;  %v788_v51 = vadd.f32 -0.39, %v687_v39  ;;  %v804_v19 = vsub.f32 0.49, %v687_v39 }
 0x138   :  { %v796_v52 = vadd.f32 -0.39, %v695_v40  ;;  %v1787_v53 = vmax.f32 %v817_v49, 0.0  ;;  %v825_v54 = vsel %vm777_vm10, %v793_v48, %v809_v14  ;;  %v812_v15 = vsub.f32 0.49, %v695_v40 }
 0x139   :  { %v787_v55 = vadd.f32 -0.39, %v686_v27  ;;  %v1792_v57 = vmax.f32 %v825_v54, 0.0  ;;  %v820_v3 = vsel %vm772_vm11, %v788_v51, %v804_v19  ;;  %v803_v58 = vsub.f32 0.49, %v686_v27 }
 0x13a   :  { %v678_v59 = vmul.f32 2.0, %v528_v26  ;;  %v1797_v61 = vmax.f32 %v820_v3, 0.0  ;;  %v828_v9 = vsel %vm780_vm12, %v796_v52, %v812_v15  ;;  %v673_v8 = vmul.f32 2.0, %v1225_v37 }
 0x13b   :  { %v681_v46 = vmul.f32 2.0, %v1237_v38  ;;  %v1802_v11 = vmax.f32 %v828_v9, 0.0  ;;  %v819_v13 = vsel %vm771_vm13, %v787_v55, %v803_v58  ;;  %v672_v20 = vmul.f32 2.0, %v498_v42  ;;  %v857_v9 = vld [vmem:[#allocation2] sm:$0x1] (!%p1663_p9) }
 0x13c   :  { %v694_v4 = vsub.f32 %v1715_v28, %v678_v59  ;;  %v1808_v21 = vmax.f32 %v819_v13, 0.0  ;;  %v689_v25 = vsub.f32 %v1703_v16, %v673_v8  ;;  %v680_v29 = vmul.f32 2.0, %v538_v43 }
 0x13d   :  { %v697_v26 = vsub.f32 %v1717_v33, %v681_v46  ;;  %vm782_vm2 = vcmp.eq.s32.totalorder %v762_v60, %v1711_v24  ;;  %v688_v18 = vsub.f32 %v1705_v17, %v672_v20  ;;  %vm781_vm3 = vcmp.eq.s32.totalorder %v759_v31, %v1711_v24 }
 0x13e   :  { %v795_v50 = vadd.f32 -0.39, %v694_v4  ;;  %v811_v30 = vsub.f32 0.49, %v694_v4  ;;  %v790_v32 = vadd.f32 -0.39, %v689_v25  ;;  %v696_v28 = vsub.f32 %v1719_v34, %v680_v29 }
 0x13f   :  { %v806_v5 = vsub.f32 0.49, %v689_v25  ;;  %v798_v12 = vadd.f32 -0.39, %v697_v26  ;;  %v814_v36 = vsub.f32 0.49, %v697_v26  ;;  %v858_v44 = vadd.f32 (!%p1663_p9), %v1742_v56, %v1753_v63 }
 0x140   :  { %v827_v35 = vsel %vm779_vm14, %v795_v50, %v811_v30  ;;  %v789_v16 = vadd.f32 -0.39, %v688_v18  ;;  %v805_v37 = vsub.f32 0.49, %v688_v18  ;;  %v797_v22 = vadd.f32 -0.39, %v696_v28 }
 0x141   :  { %v1817_v33 = vmax.f32 %v827_v35, 0.0  ;;  %v822_v38 = vsel %vm774_vm15, %v790_v32, %v806_v5  ;;  %v813_v17 = vsub.f32 0.49, %v696_v28  ;;  %v830_v34 = vsel %vm782_vm2, %v798_v12, %v814_v36  ;;  %856 = sbr.rel (%p1663_p9) target bundleno = 365 (0x16d), region = 33 }
 0x142   :  { %v1823_v39 = vmax.f32 %v822_v38, 0.0  ;;  %v821_v40 = vsel %vm773_vm1, %v789_v16, %v805_v37  ;;  %v1830_v41 = vmax.f32 %v830_v34, 0.0  ;;  %v859_v10 = vadd.f32 (!%p1663_p9), %v858_v44, %v1787_v53 }
 0x143   :  { %v1832_v42 = vmax.f32 %v821_v40, 0.0  ;;  %v829_v43 = vsel %vm781_vm3, %v797_v22, %v813_v17 }
 0x144   :  { %v1834_v6 = vmax.f32 %v829_v43, 0.0  ;;  %v860_v23 = vadd.f32 (!%p1663_p9), %v859_v10, %v1771_v45 }
 0x146   :  { %v861_v7 = vadd.f32 (!%p1663_p9), %v860_v23, %v1808_v21 }
 0x148   :  { %v862_v24 = vadd.f32 %v861_v7, %v1797_v61 }
 0x14a   :  { %v863_v47 = vadd.f32 %v862_v24, %v1832_v42 }
 0x14c   :  { %v864_v48 = vadd.f32 %v863_v47, %v1823_v39 }
 0x14e   :  { %v865_v14 = vadd.f32 %v864_v48, %v1760_v0 }
 0x150   :  { %v866_v27 = vadd.f32 %v865_v14, %v1751_v62 }
 0x152   :  { %v867_v49 = vadd.f32 %v866_v27, %v1792_v57 }
 0x154   :  { %v868_v51 = vadd.f32 %v867_v49, %v1777_v2 }
 0x156   :  { %v869_v19 = vadd.f32 %v868_v51, %v1817_v33 }
 0x158   :  { %v870_v52 = vadd.f32 %v869_v19, %v1802_v11 }
 0x15a   :  { %v871_v54 = vadd.f32 %v870_v52, %v1834_v6 }
 0x15c   :  { %v872_v15 = vadd.f32 %v871_v54, %v1830_v41 }
 0x15e   :  { %v873_v55 = vrot.slane %v872_v15, 4 }
 0x160   :  { %v874_v3 = vadd.f32 %v873_v55, %v872_v15 }
 0x162   :  { %v875_v58 = vrot.slane %v874_v3, 2 }
 0x164   :  { %v876_v59 = vadd.f32 %v875_v58, %v874_v3 }
 0x166   :  { %v877_v60 = vrot.slane %v876_v59, 1 }
 0x168   :  { %v878_v8 = vadd.f32 %v877_v60, %v876_v59 }
 0x16a   :  { %v879_v46 = vadd.f32 %v878_v8, %v857_v9 }
 0x16c   :  { %880 = vst [vmem:[#allocation2] sm:$0x1] %v879_v46 }
 0x16d PF:  { %p881_p11 = pnand %p850_p3, %p847_p7 }
 0x16f   :  { %p882_p12 = pneg %p881_p11 }
 0x171   :  { %p883_p13 = pnand %p1115_p4, %p882_p12 }
 0x172   :  { %v888_v13 = vld [vmem:[#allocation3] sm:$0xff] (!%p883_p13)  ;;  %v889_v4 = vld [vmem:[#allocation3 + $0x8] sm:$0xff] (!%p883_p13)  ;;  %v890_v20 = vld [vmem:[#allocation3 + $0x10] sm:$0xff] (!%p883_p13) }
 0x173   :  { %886 = sbr.rel (%p883_p13) target bundleno = 418 (0x1a2), region = 37  ;;  %v891_v25 = vld [vmem:[#allocation3 + $0x18] sm:$0xff] (!%p883_p13)  ;;  %v904_v26 = vmul.f32 (!%p883_p13), %v888_v13, %v1753_v63  ;;  %v905_v29 = vmul.f32 (!%p883_p13), %v889_v4, %v1742_v56  ;;  %v892_v50 = vld [vmem:[#allocation3 + $0x20] sm:$0xff] (!%p883_p13)  ;;  %v906_v30 = vmul.f32 (!%p883_p13), %v890_v20, %v1787_v53  ;;  %v893_v32 = vld [vmem:[#allocation3 + $0x28] sm:$0xff] (!%p883_p13) }
 0x174   :  { %v907_v18 = vmul.f32 (!%p883_p13), %v891_v25, %v1771_v45  ;;  %v908_v5 = vmul.f32 (!%p883_p13), %v892_v50, %v1808_v21  ;;  %v894_v28 = vld [vmem:[#allocation3 + $0x30] sm:$0xff] (!%p883_p13)  ;;  %v909_v35 = vmul.f32 (!%p883_p13), %v893_v32, %v1797_v61  ;;  %v895_v16 = vld [vmem:[#allocation3 + $0x38] sm:$0xff] (!%p883_p13)  ;;  %v896_v22 = vld [vmem:[#allocation3 + $0x40] sm:$0xff] (!%p883_p13) }
 0x175   :  { %v920_v31 = vadd.f32 (!%p883_p13), %v905_v29, %v904_v26  ;;  %v910_v37 = vmul.f32 (!%p883_p13), %v894_v28, %v1832_v42  ;;  %v911_v17 = vmul.f32 (!%p883_p13), %v895_v16, %v1823_v39  ;;  %v897_v40 = vld [vmem:[#allocation3 + $0x48] sm:$0xff] (!%p883_p13)  ;;  %v912_v43 = vmul.f32 (!%p883_p13), %v896_v22, %v1760_v0  ;;  %v898_v10 = vld [vmem:[#allocation3 + $0x50] sm:$0xff] (!%p883_p13)  ;;  %v899_v24 = vld [vmem:[#allocation3 + $0x58] sm:$0xff] (!%p883_p13) }
 0x176   :  { %v913_v23 = vmul.f32 (!%p883_p13), %v897_v40, %v1751_v62  ;;  %v914_v47 = vmul.f32 (!%p883_p13), %v898_v10, %v1792_v57  ;;  %v900_v14 = vld [vmem:[#allocation3 + $0x60] sm:$0xff] (!%p883_p13)  ;;  %v915_v27 = vmul.f32 (!%p883_p13), %v899_v24, %v1777_v2  ;;  %v901_v51 = vld [vmem:[#allocation3 + $0x68] sm:$0xff] (!%p883_p13)  ;;  %v902_v54 = vld [vmem:[#allocation3 + $0x70] sm:$0xff] (!%p883_p13) }
 0x177   :  { %v921_v12 = vadd.f32 (!%p883_p13), %v920_v31, %v906_v30  ;;  %v916_v19 = vmul.f32 (!%p883_p13), %v900_v14, %v1817_v33  ;;  %v917_v15 = vmul.f32 (!%p883_p13), %v901_v51, %v1802_v11  ;;  %v903_v3 = vld [vmem:[#allocation3 + $0x78] sm:$0xff] (!%p883_p13)  ;;  %v918_v58 = vmul.f32 (!%p883_p13), %v902_v54, %v1834_v6 }
 0x178   :  { %v919_v60 = vmul.f32 (!%p883_p13), %v903_v3, %v1830_v41  ;;  %v887_v29 = vld [vmem:[#allocation2] sm:$0x1] (!%p883_p13) }
 0x179   :  { %v922_v36 = vadd.f32 (!%p883_p13), %v921_v12, %v907_v18 }
 0x17b   :  { %v923_v38 = vadd.f32 %v922_v36, %v908_v5 }
 0x17d   :  { %v924_v34 = vadd.f32 %v923_v38, %v909_v35 }
 0x17f   :  { %v925_v44 = vadd.f32 %v924_v34, %v910_v37 }
 0x181   :  { %v926_v7 = vadd.f32 %v925_v44, %v911_v17 }
 0x183   :  { %v927_v48 = vadd.f32 %v926_v7, %v912_v43 }
 0x185   :  { %v928_v49 = vadd.f32 %v927_v48, %v913_v23 }
 0x187   :  { %v929_v52 = vadd.f32 %v928_v49, %v914_v47 }
 0x189   :  { %v930_v55 = vadd.f32 %v929_v52, %v915_v27 }
 0x18b   :  { %v931_v59 = vadd.f32 %v930_v55, %v916_v19 }
 0x18d   :  { %v932_v9 = vadd.f32 %v931_v59, %v917_v15 }
 0x18f   :  { %v933_v8 = vadd.f32 %v932_v9, %v918_v58 }
 0x191   :  { %v934_v46 = vadd.f32 %v933_v8, %v919_v60 }
 0x193   :  { %v935_v13 = vrot.slane %v934_v46, 4 }
 0x195   :  { %v936_v4 = vadd.f32 %v935_v13, %v934_v46 }
 0x197   :  { %v937_v20 = vrot.slane %v936_v4, 2 }
 0x199   :  { %v938_v25 = vadd.f32 %v937_v20, %v936_v4 }
 0x19b   :  { %v939_v26 = vrot.slane %v938_v25, 1 }
 0x19d   :  { %v940_v50 = vadd.f32 %v939_v26, %v938_v25 }
 0x19f   :  { %v941_v30 = vadd.f32 %v940_v50, %v887_v29 }
 0x1a1   :  { %942 = vst [vmem:[#allocation2] sm:$0x1] %v941_v30 }
 0x1a2 PF:  { %p943_p0 = scmp.ne.s32.totalorder %s1959_s0, %s1960_s1 }
 0x1a4   :  { %p944_p1 = pnand %p943_p0, %p848_p8 }
 0x1a6   :  { %p945_p2 = pneg %p944_p1 }
 0x1a8   :  { %p946_p3 = pnand %p1115_p4, %p945_p2 }
 0x1a9   :  { %v952_v18 = vadd.f32 (!%p946_p3), %v1742_v56, %v1753_v63  ;;  %v951_v24 = vld [vmem:[#allocation4] sm:$0x1] (!%p946_p3)  ;;  %v950_v48 = vld [vmem:[#allocation2] sm:$0x1] (!%p946_p3) }
 0x1aa   :  { %949 = sbr.rel (%p946_p3) target bundleno = 472 (0x1d8), region = 41 }
 0x1ab   :  { %v953_v31 = vadd.f32 (!%p946_p3), %v952_v18, %v1787_v53 }
 0x1ad   :  { %v954_v32 = vadd.f32 (!%p946_p3), %v953_v31, %v1771_v45 }
 0x1af   :  { %v955_v5 = vadd.f32 (!%p946_p3), %v954_v32, %v1808_v21 }
 0x1b1   :  { %v956_v12 = vadd.f32 %v955_v5, %v1797_v61 }
 0x1b3   :  { %v957_v28 = vadd.f32 %v956_v12, %v1832_v42 }
 0x1b5   :  { %v958_v35 = vadd.f32 %v957_v28, %v1823_v39 }
 0x1b7   :  { %v959_v36 = vadd.f32 %v958_v35, %v1760_v0 }
 0x1b9   :  { %v960_v16 = vadd.f32 %v959_v36, %v1751_v62 }
 0x1bb   :  { %v961_v37 = vadd.f32 %v960_v16, %v1792_v57 }
 0x1bd   :  { %v962_v38 = vadd.f32 %v961_v37, %v1777_v2 }
 0x1bf   :  { %v963_v22 = vadd.f32 %v962_v38, %v1817_v33 }
 0x1c1   :  { %v964_v17 = vadd.f32 %v963_v22, %v1802_v11 }
 0x1c3   :  { %v965_v34 = vadd.f32 %v964_v17, %v1834_v6 }
 0x1c5   :  { %v966_v40 = vadd.f32 %v965_v34, %v1830_v41 }
 0x1c7   :  { %v967_v43 = vrot.slane %v966_v40, 4 }
 0x1c9   :  { %v968_v44 = vadd.f32 %v967_v43, %v966_v40 }
 0x1cb   :  { %v969_v10 = vrot.slane %v968_v44, 2 }
 0x1cd   :  { %v970_v23 = vadd.f32 %v969_v10, %v968_v44 }
 0x1cf   :  { %v971_v7 = vrot.slane %v970_v23, 1 }
 0x1d1   :  { %v972_v47 = vadd.f32 %v971_v7, %v970_v23 }
 0x1d3   :  { %v973_v14 = vmul.f32 %v972_v47, %v951_v24 }
 0x1d5   :  { %v974_v27 = vadd.f32 %v973_v14, %v950_v48 }
 0x1d7   :  { %975 = vst [vmem:[#allocation2] sm:$0x1] %v974_v27 }
 0x1d8 PF:  { %p976_p5 = pnand %p848_p8, %p847_p7 }
 0x1da   :  { %p977_p6 = pneg %p976_p5 }
 0x1dc   :  { %p978_p9 = pnand %p1115_p4, %p977_p6 }
 0x1dd   :  { %v984_v49 = vld [vmem:[#allocation3] sm:$0xff] (!%p978_p9)  ;;  %v985_v51 = vld [vmem:[#allocation3 + $0x8] sm:$0xff] (!%p978_p9)  ;;  %v986_v19 = vld [vmem:[#allocation3 + $0x10] sm:$0xff] (!%p978_p9) }
 0x1de   :  { %981 = sbr.rel (%p978_p9) target bundleno = 527 (0x20f), region = 45  ;;  %v987_v52 = vld [vmem:[#allocation3 + $0x18] sm:$0xff] (!%p978_p9)  ;;  %v1000_v54 = vmul.f32 (!%p978_p9), %v984_v49, %v1753_v63  ;;  %v1001_v15 = vmul.f32 (!%p978_p9), %v985_v51, %v1742_v56  ;;  %v1002_v55 = vmul.f32 (!%p978_p9), %v986_v19, %v1787_v53  ;;  %v988_v3 = vld [vmem:[#allocation3 + $0x20] sm:$0xff] (!%p978_p9)  ;;  %v989_v60 = vld [vmem:[#allocation3 + $0x28] sm:$0xff] (!%p978_p9) }
 0x1df   :  { %v1003_v58 = vmul.f32 (!%p978_p9), %v987_v52, %v1771_v45  ;;  %v1004_v9 = vmul.f32 (!%p978_p9), %v988_v3, %v1808_v21  ;;  %v990_v46 = vld [vmem:[#allocation3 + $0x30] sm:$0xff] (!%p978_p9)  ;;  %v1005_v13 = vmul.f32 (!%p978_p9), %v989_v60, %v1797_v61  ;;  %v991_v20 = vld [vmem:[#allocation3 + $0x38] sm:$0xff] (!%p978_p9)  ;;  %v992_v26 = vld [vmem:[#allocation3 + $0x40] sm:$0xff] (!%p978_p9) }
 0x1e0   :  { %v1016_v59 = vadd.f32 (!%p978_p9), %v1001_v15, %v1000_v54  ;;  %v1006_v25 = vmul.f32 (!%p978_p9), %v990_v46, %v1832_v42  ;;  %v1007_v56 = vmul.f32 (!%p978_p9), %v991_v20, %v1823_v39  ;;  %v993_v29 = vld [vmem:[#allocation3 + $0x48] sm:$0xff] (!%p978_p9)  ;;  %v1008_v45 = vmul.f32 (!%p978_p9), %v992_v26, %v1760_v0  ;;  %v994_v30 = vld [vmem:[#allocation3 + $0x50] sm:$0xff] (!%p978_p9)  ;;  %v995_v31 = vld [vmem:[#allocation3 + $0x58] sm:$0xff] (!%p978_p9) }
 0x1e1   :  { %v1009_v21 = vmul.f32 (!%p978_p9), %v993_v29, %v1751_v62  ;;  %v1010_v61 = vmul.f32 (!%p978_p9), %v994_v30, %v1792_v57  ;;  %v996_v5 = vld [vmem:[#allocation3 + $0x60] sm:$0xff] (!%p978_p9)  ;;  %v1011_v42 = vmul.f32 (!%p978_p9), %v995_v31, %v1777_v2  ;;  %v997_v28 = vld [vmem:[#allocation3 + $0x68] sm:$0xff] (!%p978_p9)  ;;  %v998_v36 = vld [vmem:[#allocation3 + $0x70] sm:$0xff] (!%p978_p9) }
 0x1e2   :  { %v1017_v8 = vadd.f32 (!%p978_p9), %v1016_v59, %v1002_v55  ;;  %v1012_v39 = vmul.f32 (!%p978_p9), %v996_v5, %v1817_v33  ;;  %v1013_v0 = vmul.f32 (!%p978_p9), %v997_v28, %v1802_v11  ;;  %v999_v37 = vld [vmem:[#allocation3 + $0x78] sm:$0xff] (!%p978_p9)  ;;  %v1014_v62 = vmul.f32 (!%p978_p9), %v998_v36, %v1834_v6  ;;  %v983_v33 = vld [vmem:[#allocation4] sm:$0x1] (!%p978_p9) }
 0x1e3   :  { %v1015_v22 = vmul.f32 (!%p978_p9), %v999_v37, %v1830_v41  ;;  %v982_v7 = vld [vmem:[#allocation2] sm:$0x1] (!%p978_p9) }
 0x1e4   :  { %v1018_v4 = vadd.f32 (!%p978_p9), %v1017_v8, %v1003_v58 }
 0x1e6   :  { %v1019_v63 = vadd.f32 %v1018_v4, %v1004_v9 }
 0x1e8   :  { %v1020_v53 = vadd.f32 %v1019_v63, %v1005_v13 }
 0x1ea   :  { %v1021_v50 = vadd.f32 %v1020_v53, %v1006_v25 }
 0x1ec   :  { %v1022_v18 = vadd.f32 %v1021_v50, %v1007_v56 }
 0x1ee   :  { %v1023_v32 = vadd.f32 %v1022_v18, %v1008_v45 }
 0x1f0   :  { %v1024_v12 = vadd.f32 %v1023_v32, %v1009_v21 }
 0x1f2   :  { %v1025_v35 = vadd.f32 %v1024_v12, %v1010_v61 }
 0x1f4   :  { %v1026_v16 = vadd.f32 %v1025_v35, %v1011_v42 }
 0x1f6   :  { %v1027_v38 = vadd.f32 %v1026_v16, %v1012_v39 }
 0x1f8   :  { %v1028_v57 = vadd.f32 %v1027_v38, %v1013_v0 }
 0x1fa   :  { %v1029_v17 = vadd.f32 %v1028_v57, %v1014_v62 }
 0x1fc   :  { %v1030_v34 = vadd.f32 %v1029_v17, %v1015_v22 }
 0x1fe   :  { %v1031_v40 = vrot.slane %v1030_v34, 4 }
 0x200   :  { %v1032_v2 = vadd.f32 %v1031_v40, %v1030_v34 }
 0x202   :  { %v1033_v43 = vrot.slane %v1032_v2, 2 }
 0x204   :  { %v1034_v44 = vadd.f32 %v1033_v43, %v1032_v2 }
 0x206   :  { %v1035_v10 = vrot.slane %v1034_v44, 1 }
 0x208   :  { %v1036_v23 = vadd.f32 %v1035_v10, %v1034_v44 }
 0x20a   :  { %v1037_v24 = vmul.f32 %v1036_v23, %v983_v33 }
 0x20c   :  { %v1038_v11 = vadd.f32 %v1037_v24, %v982_v7 }
 0x20e   :  { %1039 = vst [vmem:[#allocation2] sm:$0x1] %v1038_v11 }
 0x20f PF:  { %1043 = vst [vmem:[#allocation9] sm:$0xff] %v1331_v1  ;;  %s1333_s0 = smov [#allocation9]  }
 0x210   :  { %s1052_s1 = sshll.u32 %s1333_s0, 4  ;;  %s1053_s1 = int_to_ptr.vmem [resolvable:$true] %s1052_s1 }
 0x211   :  { %s1307_s2 = scalar_lea.vmem %s1053_s1, 128  ;;  %p1312_p7 = scmp.lt.s32.totalorder %s1053_s1, %s1053_s1 }
 0x212   :  { %p1308_p4 = scmp.ne.s32.totalorder %s1053_s1, %s1307_s2  ;;  %p1313_p8 = scmp.lt.s32.totalorder %s1307_s2, %s1307_s2 }
 0x214   :  { %p1314_p10 = por %p1313_p8, %p1312_p7 }
 0x215   :  { %v1044_v6 = vld [vmem:[#allocation2] sm:$0x1] }
 0x216   :  { %1045 = vst [vmem:[#allocation9] sm:$0x1] %v1044_v6  ;;  %p1315_p11 = pnand %p1314_p10, %p1308_p4 }
 0x218   :  { %1318 = shalt.err (!%p1315_p11)
}
 0x219   :  { %s1319_s29 = scalar_lea.hbm %s1968_s9, 128 }
 0x21a   :  { %p1320_p12 = scmp.ne.s32.totalorder %s1968_s9, %s1319_s29  ;;  %p1323_p13 = scmp.lt.u32.totalorder %s1319_s29, %s1968_s9 }
 0x21c   :  { %p1325_p0 = pnand %p1323_p13, %p1320_p12 }
 0x21e   :  { %1328 = shalt.err (!%p1325_p0)
}
 0x21f   :  { %1055 = dma.vmem_to_hbm [thread:$0]  %s1053_s1, 128, %s1968_s9, [#allocation10]  }
 0x220   :  { %1329 = dma.done.wait [#allocation10], 128  }
 0x221   :  { %1330 = vsyncadd [#allocation10], 4294967168 }
 0x222   :  { %1059 = vsyncpa [#allocation10], 1 }

</bundles_post_ra>
